<compile_context>
chip_gen: v7x
topology: tpu7x:2x2x1
jax: 0.10.0
libtpu: 0.0.40
codegen_flags: <defaults>
</compile_context>

<pallas_src>
import functools

import jax
import jax.numpy as jnp
from jax.experimental import pallas as pl
from jax.experimental.pallas import tpu as pltpu

LANE = 128


def _default_config():
    """Returns (ncores, tile_r_max) tuned per TPU generation."""
    try:
        kind = jax.devices()[0].device_kind.lower()
    except Exception:
        kind = ""
    # Chips with two TensorCores per device: v7x (and classic megacore v4/v5p).
    two_core = any(tag in kind for tag in ("v7", "7x", "v4", "v5p"))
    if "v6" in kind:
        tile_r_max = 8192   # 4 MiB/stream f32, 16 MiB pipelined < 32 MiB scoped default
    else:
        tile_r_max = 4096   # safe for v5e's 16 MiB scoped default and v7x's 64 MiB VMEM/TC
    return (2 if two_core else 1), tile_r_max


def _pick_tile_rows(rows, ncores, tile_r_max):
    """Rows per block: big, 32-row aligned (covers 8/16/32-bit packing), <= rows."""
    t = min(tile_r_max, pl.cdiv(rows, ncores))
    if rows >= 32:
        t = pl.cdiv(t, 32) * 32
        t = min(t, (rows // 32) * 32)   # stay a multiple of 32 and never exceed the array
    else:
        t = rows                        # tiny input: one full-extent block (allowed)
    return t


def _bce_kernel(x_ref, y_ref, out_ref, acc_ref, *,
                tile_r, full_rows, rem, needs_mask):
    c = pl.program_id(0)              # core ("parallel") axis
    i = pl.program_id(1)              # reduction ("arbitrary") axis
    inner = pl.num_programs(1)

    @pl.when(i == 0)
    def _():
        acc_ref[...] = jnp.zeros_like(acc_ref)

    x = x_ref[...].astype(jnp.float32)
    y = y_ref[...].astype(jnp.float32)

    # Numerically-stable BCE-with-logits, identical to PyTorch's formulation.
    per = jnp.maximum(x, 0.0) - x * y + jnp.log1p(jnp.exp(-jnp.abs(x)))

    # Row-unit offsets: no int32 overflow for any realistic n (< 2**31 rows).
    block_row0 = (c * inner + i) * tile_r

    def _accumulate(vals):
        if tile_r % 8 == 0:
            # (tile_r,128) -> (tile_r//8, 8, 128); summing the leading axis is
            # pure VPU vreg adds into the single-vreg (8,128) accumulator.
            acc_ref[...] += vals.reshape(tile_r // 8, 8, LANE).sum(axis=0)
        else:
            # Tiny-input path (tile_r == rows < 32): accumulator is (tile_r,128).
            acc_ref[...] += vals

    if needs_mask:
        @pl.when(block_row0 + tile_r <= full_rows)
        def _():
            _accumulate(per)                      # fully-valid block: no mask work

        @pl.when(block_row0 + tile_r > full_rows)
        def _():
            row = jax.lax.broadcasted_iota(jnp.int32, (tile_r, LANE), 0) + block_row0
            if rem:
                lane = jax.lax.broadcasted_iota(jnp.int32, (tile_r, LANE), 1)
                valid = (row < full_rows) | ((row == full_rows) & (lane < rem))
            else:
                valid = row < full_rows
            _accumulate(jnp.where(valid, per, 0.0))
    else:
        _accumulate(per)

    @pl.when(i == inner - 1)
    def _():
        # Single cross-lane/sublane reduction, once per core.
        out_ref[0, 0] = jnp.sum(acc_ref[...])


def bce_with_logits_loss(y_pred, y_true, *, ncores=None, tile_r_max=None):
    """Equivalent of BCELoss().forward(y_pred, y_true) from the PyTorch module.

    y_pred: (N, 1, H, W) logits (channel dim squeezed, torch-style).
    y_true: (N, H, W) targets (cast to float inside the kernel).
    Returns a scalar float32 mean loss.
    """
    # torch's `.squeeze(1)` only drops dim 1 when it has size 1.
    if y_pred.ndim > 1 and y_pred.shape[1] == 1:
        x = jnp.squeeze(y_pred, axis=1)
    else:
        x = y_pred
    y = y_true
    assert x.shape == y.shape, "y_pred.squeeze(1) and y_true must match shapes"

    # Keep storage dtypes: casting to f32 happens on the VPU inside the kernel.
    if y.dtype == jnp.bool_:
        y = y.astype(jnp.uint8)

    n = x.size
    assert n > 0
    # Row-unit int32 indexing inside the kernel requires rows < 2**31.
    assert n < (1 << 31) * LANE, "input too large for int32 row indexing"

    x = x.reshape(-1)                 # free: contiguous row-major reshape
    y = y.reshape(-1)

    d_ncores, d_tile = _default_config()
    ncores = d_ncores if ncores is None else ncores
    tile_r_max = d_tile if tile_r_max is None else tile_r_max

    # Rare path: pad the flat tail up to the next 128-lane row (< 128 elements).
    # Image tensors are virtually always 128-aligned, so this is usually skipped
    # entirely and no copy is made.  Padded lanes are masked in-kernel.
    rem = n % LANE
    if rem:
        x = jnp.pad(x, (0, LANE - rem))
        y = jnp.pad(y, (0, LANE - rem))

    rows = x.shape[0] // LANE
    x2 = x.reshape(rows, LANE)        # free reshape
    y2 = y.reshape(rows, LANE)

    full_rows = n // LANE             # number of fully-valid 128-lane rows
    tile_r = _pick_tile_rows(rows, ncores, tile_r_max)
    num_blocks = pl.cdiv(rows, tile_r)
    inner = pl.cdiv(num_blocks, ncores)
    # Mask only needed if there is a ragged lane tail, a partial last block, or
    # overshoot blocks from the core split (all static facts).
    needs_mask = (rem != 0) or (ncores * inner * tile_r != rows)

    def idx_map(c, i, _inner=inner, _last=num_blocks - 1):
        # Clamp overshoot blocks (odd block count split across 2 cores) onto the
        # last valid block; the kernel masks their contribution to zero.
        return (jnp.minimum(c * _inner + i, _last), 0)

    acc_rows = 8 if tile_r % 8 == 0 else tile_r
    kernel = functools.partial(_bce_kernel, tile_r=tile_r, full_rows=full_rows,
                               rem=rem, needs_mask=needs_mask)

    # Double-buffered input streams (both dtypes kept narrow), plus headroom.
    buf_bytes = 2 * tile_r * LANE * (x2.dtype.itemsize + y2.dtype.itemsize)
    vmem_limit = int(min(max(buf_bytes + (8 << 20), 32 << 20), 64 << 20))

    partials = pl.pallas_call(
        kernel,
        out_shape=jax.ShapeDtypeStruct((ncores, 1), jnp.float32),
        grid_spec=pltpu.PrefetchScalarGridSpec(
            num_scalar_prefetch=0,
            grid=(ncores, inner),
            in_specs=[
                pl.BlockSpec((tile_r, LANE), idx_map),
                pl.BlockSpec((tile_r, LANE), idx_map),
            ],
            out_specs=pl.BlockSpec((1, 1), lambda c, i: (c, 0),
                                   memory_space=pltpu.SMEM),
            scratch_shapes=[pltpu.VMEM((acc_rows, LANE), jnp.float32)],
        ),
        compiler_params=pltpu.CompilerParams(
            dimension_semantics=("parallel", "arbitrary"),
            vmem_limit_bytes=vmem_limit,
        ),
    )(x2, y2)

    # Sum the per-core partial sums, then normalize once by the true element count.
    return jnp.sum(partials) / jnp.float32(n)


def _reference(y_pred, y_true):
    x = jnp.squeeze(y_pred, axis=1).astype(jnp.float32)
    y = y_true.astype(jnp.float32)
    per = jnp.maximum(x, 0.0) - x * y + jnp.log1p(jnp.exp(-jnp.abs(x)))
    return jnp.mean(per)


if __name__ == "__main__":
    key = jax.random.PRNGKey(0)
    k_pred, k_true = jax.random.split(key)

    N, H, W = 2, 16, 16
    y_pred = jax.random.normal(k_pred, (N, 1, H, W), dtype=jnp.float32)
    y_true = jax.random.bernoulli(k_true, p=0.5, shape=(N, H, W)).astype(
        jnp.float32
    )

    loss = bce_with_logits_loss(y_pred, y_true)
    loss = jax.block_until_ready(loss)

    ref = _reference(y_pred, y_true)
    assert jnp.allclose(loss, ref, rtol=1e-5, atol=1e-6), (loss, ref)

    print("KERNEL_OK")
</pallas_src>

<mosaic_0001>
module attributes {stable_mosaic.version = 11 : i64} {
  func.func @_bce_kernel(%arg0: i32, %arg1: i32, %arg2: memref<4x128xf32, #tpu.memory_space<vmem>>, %arg3: memref<4x128xf32, #tpu.memory_space<vmem>>, %arg4: memref<1x1xf32, #tpu.memory_space<smem>>, %arg5: memref<4x128xf32, #tpu.memory_space<vmem>>) attributes {dimension_semantics = [#tpu.dimension_semantics<parallel>, #tpu.dimension_semantics<arbitrary>], iteration_bounds = array<i64: 1, 1>, scalar_prefetch = 0 : i64, scratch_operands = 1 : i64, tpu.core_type = #tpu.core_type<tc>, window_params = [{transform_indices = @transform_0, window_bounds = array<i64: 4, 128>}, {transform_indices = @transform_1, window_bounds = array<i64: 4, 128>}, {transform_indices = @transform_2, window_bounds = array<i64: 1, 1>}]} {
    %c0_i32 = arith.constant 0 : i32
    %0 = arith.cmpi eq, %arg1, %c0_i32 : i32
    %1 = arith.extui %0 : i1 to i32
    %c0_i32_0 = arith.constant 0 : i32
    %2 = arith.cmpi ne, %1, %c0_i32_0 : i32
    scf.if %2 {
      %cst_11 = arith.constant 0.000000e+00 : f32
      %21 = vector.broadcast %cst_11 : f32 to vector<4x128xf32>
      %c0_12 = arith.constant 0 : index
      %c0_13 = arith.constant 0 : index
      %22 = vector.load %arg5[%c0_12, %c0_13] : memref<4x128xf32, #tpu.memory_space<vmem>>, vector<4x128xf32>
      tpu.vector_store %arg5[%c0_12, %c0_13], %21 {strides = array<i32>} : memref<4x128xf32, #tpu.memory_space<vmem>>, vector<4x128xf32>,
    } else {
    }
    %c0 = arith.constant 0 : index
    %c0_1 = arith.constant 0 : index
    %3 = vector.load %arg2[%c0, %c0_1] : memref<4x128xf32, #tpu.memory_space<vmem>>, vector<4x128xf32>
    %c0_2 = arith.constant 0 : index
    %c0_3 = arith.constant 0 : index
    %4 = vector.load %arg3[%c0_2, %c0_3] : memref<4x128xf32, #tpu.memory_space<vmem>>, vector<4x128xf32>
    %cst = arith.constant 0.000000e+00 : f32
    %5 = vector.broadcast %cst : f32 to vector<4x128xf32>
    %6 = arith.maximumf %3, %5 : vector<4x128xf32>
    %7 = arith.mulf %3, %4 : vector<4x128xf32>
    %8 = arith.subf %6, %7 : vector<4x128xf32>
    %9 = math.absf %3 : vector<4x128xf32>
    %cst_4 = arith.constant 0.000000e+00 : f32
    %10 = vector.broadcast %cst_4 : f32 to vector<4x128xf32>
    %11 = arith.subf %10, %9 : vector<4x128xf32>
    %12 = math.exp %11 : vector<4x128xf32>
    %13 = math.log1p %12 : vector<4x128xf32>
    %14 = arith.addf %8, %13 : vector<4x128xf32>
    %c0_5 = arith.constant 0 : index
    %c0_6 = arith.constant 0 : index
    %15 = vector.load %arg5[%c0_5, %c0_6] : memref<4x128xf32, #tpu.memory_space<vmem>>, vector<4x128xf32>
    %16 = arith.addf %15, %14 : vector<4x128xf32>
    %c0_7 = arith.constant 0 : index
    %c0_8 = arith.constant 0 : index
    %17 = vector.load %arg5[%c0_7, %c0_8] : memref<4x128xf32, #tpu.memory_space<vmem>>, vector<4x128xf32>
    tpu.vector_store %arg5[%c0_7, %c0_8], %16 {strides = array<i32>} : memref<4x128xf32, #tpu.memory_space<vmem>>, vector<4x128xf32>,
    %c0_i32_9 = arith.constant 0 : i32
    %18 = arith.cmpi eq, %arg1, %c0_i32_9 : i32
    %19 = arith.extui %18 : i1 to i32
    %c0_i32_10 = arith.constant 0 : i32
    %20 = arith.cmpi ne, %19, %c0_i32_10 : i32
    scf.if %20 {
      %c0_11 = arith.constant 0 : index
      %c0_12 = arith.constant 0 : index
      %21 = vector.load %arg5[%c0_11, %c0_12] : memref<4x128xf32, #tpu.memory_space<vmem>>, vector<4x128xf32>
      %22 = vector.shape_cast %21 : vector<4x128xf32> to vector<1x4x128xf32>
      %cst_13 = arith.constant dense<0.000000e+00> : vector<1xf32>
      %23 = vector.multi_reduction <add>, %22, %cst_13 [1, 2] : vector<1x4x128xf32> to vector<1xf32>
      %24 = vector.shape_cast %23 : vector<1xf32> to vector<1x1x1xf32>
      %25 = vector.extract %24[0, 0, 0] : f32 from vector<1x1x1xf32>
      %c0_14 = arith.constant 0 : index
      %c0_15 = arith.constant 0 : index
      %26 = memref.load %arg4[%c0_14, %c0_15] : memref<1x1xf32, #tpu.memory_space<smem>>
      memref.store %25, %arg4[%c0_14, %c0_15] : memref<1x1xf32, #tpu.memory_space<smem>>
    } else {
    }
    return
  }
  func.func @transform_0(%arg0: i32, %arg1: i32) -> (i32, i32) {
    %c1_i32 = arith.constant 1 : i32
    %0 = arith.muli %arg0, %c1_i32 : i32
    %1 = arith.addi %0, %arg1 : i32
    %c0_i32 = arith.constant 0 : i32
    %2 = arith.minsi %1, %c0_i32 : i32
    %c0_i32_0 = arith.constant 0 : i32
    %c0_i32_1 = arith.constant 0 : i32
    return %2, %c0_i32_0 : i32, i32
  }
  func.func @transform_1(%arg0: i32, %arg1: i32) -> (i32, i32) {
    %c1_i32 = arith.constant 1 : i32
    %0 = arith.muli %arg0, %c1_i32 : i32
    %1 = arith.addi %0, %arg1 : i32
    %c0_i32 = arith.constant 0 : i32
    %2 = arith.minsi %1, %c0_i32 : i32
    %c0_i32_0 = arith.constant 0 : i32
    %c0_i32_1 = arith.constant 0 : i32
    return %2, %c0_i32_0 : i32, i32
  }
  func.func @transform_2(%arg0: i32, %arg1: i32) -> (i32, i32) {
    %c0_i32 = arith.constant 0 : i32
    %c0_i32_0 = arith.constant 0 : i32
    return %arg0, %c0_i32 : i32, i32
  }
}

</mosaic_0001>

<bundles_post_ra>
// kernel: tpu_custom_call.1
= control target key start
LH: loop header
LB: loop body
LE: loop exit
PB: predicated region body
PF: predicated region fallthrough
CT: control target
= control target key end

     0   :  { %7 = vsyncpa [#allocation4], 0  ;;  %s240_s0 = inlined_call_operand.hbm [shape: f32[4,128], index: 0, kind: input, shape index: {}]   ;;  %s241_s1 = inlined_call_operand.hbm [shape: f32[4,128], index: 1, kind: input, shape index: {}]   ;;  %s242_s2 = inlined_call_operand.hbm [shape: f32[1,1], index: 2, kind: output, shape index: {}]  }
   0x1   :  { %8 = vsyncpa [#allocation7], 0 }
   0x2   :  { %9 = vsyncpa [#allocation5], 0  ;;  %s185_s9 = smov [#allocation3]   ;;  %s186_s11 = smov [#allocation6]  }
   0x3   :  { %s21_s10 = sshll.u32 %s185_s9, 4  ;;  %s36_s12 = sshll.u32 %s186_s11, 4  ;;  %s22_s10 = int_to_ptr.vmem [resolvable:$true] %s21_s10  ;;  %s37_s12 = int_to_ptr.vmem [resolvable:$true] %s36_s12 }
   0x4   :  { %s125_s15 = scalar_lea.hbm %s240_s0, 64 }
   0x5   :  { %p126_p0 = scmp.ne.s32.totalorder %s240_s0, %s125_s15  ;;  %p129_p1 = scmp.lt.u32.totalorder %s125_s15, %s240_s0 }
   0x7   :  { %p131_p2 = pnand %p129_p1, %p126_p0 }
   0x9   :  { %134 = shalt.err (!%p131_p2)
}
   0xa   :  { %s135_s20 = scalar_lea.vmem %s22_s10, 64  ;;  %p140_p4 = scmp.lt.s32.totalorder %s22_s10, %s22_s10 }
   0xb   :  { %p136_p3 = scmp.ne.s32.totalorder %s22_s10, %s135_s20  ;;  %p141_p5 = scmp.lt.s32.totalorder %s135_s20, %s135_s20 }
   0xd   :  { %p142_p6 = por %p141_p5, %p140_p4 }
   0xf   :  { %p143_p7 = pnand %p142_p6, %p136_p3 }
  0x11   :  { %146 = shalt.err (!%p143_p7)
}
  0x12   :  { %24 = dma.hbm_to_vmem [thread:$0]  %s240_s0, 64, %s22_s10, [#allocation4]  }
  0x13   :  { %s147_s25 = scalar_lea.hbm %s241_s1, 64 }
  0x14   :  { %p148_p8 = scmp.ne.s32.totalorder %s241_s1, %s147_s25  ;;  %p151_p9 = scmp.lt.u32.totalorder %s147_s25, %s241_s1 }
  0x16   :  { %p153_p10 = pnand %p151_p9, %p148_p8 }
  0x18   :  { %156 = shalt.err (!%p153_p10)
}
  0x19   :  { %s157_s30 = scalar_lea.vmem %s37_s12, 64  ;;  %p162_p12 = scmp.lt.s32.totalorder %s37_s12, %s37_s12 }
  0x1a   :  { %p158_p11 = scmp.ne.s32.totalorder %s37_s12, %s157_s30  ;;  %p163_p13 = scmp.lt.s32.totalorder %s157_s30, %s157_s30 }
  0x1c   :  { %p164_p0 = por %p163_p13, %p162_p12 }
  0x1e   :  { %p165_p1 = pnand %p164_p0, %p158_p11 }
  0x20   :  { %168 = shalt.err (!%p165_p1)
}
  0x21   :  { %39 = dma.hbm_to_vmem [thread:$0]  %s241_s1, 64, %s37_s12, [#allocation7]  }
  0x22   :  { %179 = dma.done.wait [#allocation4], 64  }
  0x23   :  { %180 = vsyncadd [#allocation4], 4294967232 }
  0x24   :  { %181 = dma.done.wait [#allocation7], 64  }
  0x25   :  { %182 = vsyncadd [#allocation7], 4294967232  ;;  %v187_v0 = vmov 0.0   ;;  %v57_v1 = vld [vmem:[#allocation3] sm:$0xf]  ;;  %vm83_vm1 = vcmask 1043456  }
  0x26   :  { %56 = vst [vmem:[#allocation2] sm:$0xf] %v187_v0  ;;  %v62_v2 = vand.u32 2147483647, %v57_v1  ;;  %v58_v8 = vld [vmem:[#allocation6] sm:$0xf] }
  0x27   :  { %v59_v10 = vmax.f32 %v57_v1, 0.0  ;;  %v60_v11 = vmul.f32 %v58_v8, %v57_v1  ;;  %s169_s6 = scalar_lea.hbm %s242_s2, 16 }
  0x28   :  { %v63_v3 = vsub.f32 0.0, %v62_v2  ;;  %p170_p2 = scmp.ne.s32.totalorder %s242_s2, %s169_s6  ;;  %p173_p3 = scmp.lt.u32.totalorder %s169_s6, %s242_s2 }
  0x29   :  { %v61_v15 = vsub.f32 %v59_v10, %v60_v11 }
  0x2a   :  { %v64_v4 = vmul.f32 1.442695, %v63_v3  ;;  %p175_p4 = pnand %p173_p3, %p170_p2 }
  0x2c   :  { %121 = vpow2.f32 %v64_v4 }
  0x2d   :  { %v76_v18 = vld [vmem:[#allocation2] sm:$0xf] }
  0x36   :  { %v122_v5 = vpop.eup %121 }
  0x37   :  { %v66_v6 = vadd.f32 1.0, %v122_v5  ;;  %v69_v7 = vmul.f32 -0.5, %v122_v5  ;;  %v72_v12 = vand.u32 2147483647, %v122_v5 }
  0x39   :  { %123 = vlog2.f32 %v66_v6  ;;  %v70_v9 = vadd.f32 1.0, %v69_v7  ;;  %vm73_vm0 = vcmp.lt.f32.partialorder %v72_v12, 0.0004427343 }
  0x3b   :  { %v71_v13 = vmul.f32 %v122_v5, %v70_v9 }
  0x43   :  { %v124_v14 = vpop.eup %123 }
  0x44   :  { %v68_v16 = vmul.f32 0.6931472, %v124_v14 }
  0x46   :  { %v74_v17 = vsel %vm73_vm0, %v71_v13, %v68_v16 }
  0x47   :  { %v75_v19 = vadd.f32 %v74_v17, %v61_v15 }
  0x49   :  { %v77_v20 = vadd.f32 %v76_v18, %v75_v19 }
  0x4b   :  { %78 = vst [vmem:[#allocation2] sm:$0xf] %v77_v20 }
  0x52   :  { %v82_v21 = vld [vmem:[#allocation2] sm:$0xf] }
  0x53   :  { %v84_v22 = vsel %vm83_vm1, %v82_v21, 0.0 }
  0x54   :  { %85 = vadd.xlane.f32.xlu0 %v84_v22 }
  0xe1   :  { %v86_v23 = vpop.xlane.xlu0 %85 }
  0xe2   :  { %v87_v24 = vrot.slane %v86_v23, 4 }
  0xe4   :  { %v88_v25 = vadd.f32 %v87_v24, %v86_v23 }
  0xe6   :  { %v89_v26 = vrot.slane %v88_v25, 2 }
  0xe8   :  { %v90_v27 = vadd.f32 %v89_v26, %v88_v25 }
  0xea   :  { %v91_v28 = vrot.slane %v90_v27, 1 }
  0xec   :  { %v92_v29 = vadd.f32 %v91_v28, %v90_v27 }
  0xee   :  { %115 = vpush %v92_v29 }
 0x11f   :  { %s116_s1 = spop %115 }
 0x120   :  { %95 = sst [smem:[#allocation8]] %s116_s1 }
 0x121   :  { %178 = shalt.err (!%p175_p4)
}
 0x122   :  { %s188_s11 = smov [#allocation8]  }
 0x123   :  { %103 = dma.smem_to_hbm %s188_s11, 16, %s242_s2, [#allocation5]  }
 0x124   :  { %183 = dma.done.wait [#allocation5], 16  }
 0x125   :  { %184 = vsyncadd [#allocation5], 4294967280 }
 0x126   :  { %107 = sfence }
 0x127   :  { %108 = vsyncpa [#allocation4], 1 }
 0x128   :  { %109 = vsyncpa [#allocation7], 1 }
 0x129   :  { %110 = vsyncpa [#allocation5], 1 }

</bundles_post_ra>
